<compile_context>
chip_gen: v7x
topology: tpu7x:2x2x1
jax: 0.10.0
libtpu: 0.0.40
codegen_flags: <defaults>
</compile_context>

<pallas_src>
import math
import functools

import jax
import jax.numpy as jnp
from jax.experimental import pallas as pl
from jax.experimental.pallas import tpu as pltpu


def _round_up(x: int, m: int) -> int:
    return (x + m - 1) // m * m


def _sublane_multiple(dtype) -> int:
    # Native sublane packing: 8 rows for 4-byte dtypes, 16 for 2-byte, 32 for 1-byte.
    return max(8, 32 // jnp.dtype(dtype).itemsize)


def _target_tile_bytes() -> int:
    # v5e (and older) HBM bandwidth is low enough that ~4 MiB tiles already make the
    # fixed per-step cost negligible; v6e/v7x benefit from ~8 MiB tiles.
    try:
        kind = jax.devices()[0].device_kind.lower()
    except Exception:
        kind = ""
    if ("v5 lite" in kind) or ("v5e" in kind) or ("v5litepod" in kind) or ("v4" in kind):
        return 4 << 20
    return 8 << 20


def _biased_act_kernel(x_ref, b_ref, o_ref, *, alpha, gain, clamp):
    # x_ref: (RB, LB)  b_ref: (RB, 1)  o_ref: (RB, LB)
    x = x_ref[...]
    b = b_ref[...]                                  # broadcasts over the lane axis
    y = x + b
    # leaky_relu with gain folded into the select: one select + one mul on the VPU.
    scale = jnp.where(y >= 0, gain, gain * alpha)
    y = y * scale
    if clamp >= 0:
        y = jnp.clip(y, -clamp, clamp)
    o_ref[...] = y.astype(o_ref.dtype)


def _choose_tiles(R: int, L: int, dtype, target_tile_bytes: int):
    """Pick (row_block, lane_block) for the unpadded [R, L] view.

    lane_block: the full row L (single contiguous DMA per row-tile) whenever a
                minimal (sub x L) tile fits the budget; otherwise wide 128-multiple
                chunks (<= 8192 lanes) with the cdiv grid masking the ragged edge.
    row_block : fills the per-tile budget; either a multiple of the dtype's sublane
                packing (8/16/32) or exactly R (full dim) — both are legal blocks.
    """
    itemsize = jnp.dtype(dtype).itemsize
    sub = _sublane_multiple(dtype)

    if L * itemsize * sub <= target_tile_bytes:
        lane_block = L                               # full row: contiguous, no edge
    else:
        lane_block = min(8192, _round_up(L, 128))    # wide chunks; cdiv handles edge

    lane_vmem_bytes = _round_up(lane_block, 128) * itemsize

    rows_budget = max(sub, (target_tile_bytes // lane_vmem_bytes) // sub * sub)
    if rows_budget >= R:
        row_block = R                                # block == full dim: always legal
    else:
        row_block = rows_budget                      # multiple of sub; edge is masked

    # Best-effort: give v7x megacore a few grid steps to shard (harmless on 1-TC chips).
    while pl.cdiv(R, row_block) * pl.cdiv(L, lane_block) < 8 and row_block >= 2 * sub:
        row_block = max(sub, (row_block // 2) // sub * sub)

    return row_block, lane_block


def biased_activation_pallas(x_nchw, bias, *, alpha=0.2, gain=None,
                             clamp=-1.0, bias_gain=1.0):
    """x_nchw: [N, C, H, W]; bias: [C].  Returns [N, C, H, W]."""
    if gain is None:
        # torch.nn.init.calculate_gain('leaky_relu', alpha)
        gain = math.sqrt(2.0 / (1.0 + alpha * alpha))

    N, C, H, W = x_nchw.shape
    R, L = N * C, H * W
    x2 = x_nchw.reshape(R, L)

    # bias_gain scaling happens in BiasedActivation.forward before the op.
    # Expand only to one scalar per (n, c) row — never to the full tensor.
    b_rows = jnp.tile((bias_gain * bias).astype(x2.dtype), N).reshape(R, 1)

    target = _target_tile_bytes()
    row_block, lane_block = _choose_tiles(R, L, x2.dtype, target)

    # VMEM limit from the actual footprint: double-buffered (in + out) tiles plus the
    # tiny bias tile, with headroom for internal scratch.  Stays well under v7x's
    # 64 MiB/TC and v5e/v6e's 128 MiB.
    itemsize = jnp.dtype(x2.dtype).itemsize
    tile_bytes = row_block * _round_up(lane_block, 128) * itemsize
    bias_tile_bytes = row_block * 128 * itemsize
    vmem_limit = int((4 * tile_bytes + 2 * bias_tile_bytes) * 1.25) + (2 << 20)
    vmem_limit = min(max(vmem_limit, 16 << 20), 48 << 20)

    kernel = functools.partial(_biased_act_kernel,
                               alpha=float(alpha), gain=float(gain),
                               clamp=float(clamp))

    grid = (pl.cdiv(R, row_block), pl.cdiv(L, lane_block))

    out = pl.pallas_call(
        kernel,
        out_shape=jax.ShapeDtypeStruct((R, L), x2.dtype),
        grid_spec=pltpu.PrefetchScalarGridSpec(
            num_scalar_prefetch=0,
            grid=grid,
            in_specs=[
                pl.BlockSpec((row_block, lane_block), lambda i, j: (i, j)),
                # Block index is independent of j, so the tiny bias tile is not
                # re-fetched across consecutive lane steps.
                pl.BlockSpec((row_block, 1), lambda i, j: (i, 0)),
            ],
            out_specs=pl.BlockSpec((row_block, lane_block), lambda i, j: (i, j)),
        ),
        compiler_params=pltpu.CompilerParams(
            dimension_semantics=("parallel", "parallel"),
            vmem_limit_bytes=vmem_limit,
        ),
    )(x2, b_rows)

    return out.reshape(N, C, H, W)


def _reference(x_nchw, bias, *, alpha, gain, clamp, bias_gain):
    b = (bias_gain * bias).astype(x_nchw.dtype).reshape(1, -1, 1, 1)
    y = x_nchw + b
    y = jnp.where(y >= 0, y, alpha * y)
    if gain != 1.0:
        y = y * gain
    if clamp >= 0:
        y = jnp.clip(y, -clamp, clamp)
    return y


if __name__ == "__main__":
    key = jax.random.PRNGKey(0)
    kx, kb, kx2 = jax.random.split(key, 3)

    alpha = 0.2
    gain = math.sqrt(2.0 / (1.0 + alpha * alpha))   # calculate_gain('leaky_relu', 0.2)

    # Case 1: BiasedActivation('leaky_relu') defaults (no clamp), 128-multiple lanes.
    N, C, H, W = 2, 4, 16, 16
    x = jax.random.normal(kx, (N, C, H, W), dtype=jnp.float32)
    bias = jax.random.normal(kb, (C,), dtype=jnp.float32)

    out = biased_activation_pallas(x, bias, alpha=alpha, gain=gain,
                                   clamp=-1.0, bias_gain=1.0)
    out = jax.block_until_ready(out)
    ref = _reference(x, bias, alpha=alpha, gain=gain, clamp=-1.0, bias_gain=1.0)
    assert out.shape == (N, C, H, W)
    assert jnp.allclose(out, ref, atol=1e-5, rtol=1e-5), "mismatch vs reference (case 1)"

    # Case 2: non-128-multiple spatial extent (ragged lane edge, NO host pad/slice),
    # clamp on, non-unit bias_gain.
    H2, W2 = 7, 7
    x2 = jax.random.normal(kx2, (N, C, H2, W2), dtype=jnp.float32)
    out2 = biased_activation_pallas(x2, bias, alpha=alpha, gain=gain,
                                    clamp=0.5, bias_gain=2.0)
    out2 = jax.block_until_ready(out2)
    ref2 = _reference(x2, bias, alpha=alpha, gain=gain, clamp=0.5, bias_gain=2.0)
    assert out2.shape == (N, C, H2, W2)
    assert jnp.allclose(out2, ref2, atol=1e-5, rtol=1e-5), "mismatch vs reference (case 2)"

    # Case 3: bf16 input (exercises dtype-aware sublane packing), clamp on.
    xb = jax.random.normal(kx, (N, C, H, W), dtype=jnp.float32).astype(jnp.bfloat16)
    out3 = biased_activation_pallas(xb, bias, alpha=alpha, gain=gain,
                                    clamp=1.0, bias_gain=1.0)
    out3 = jax.block_until_ready(out3)
    ref3 = _reference(xb, bias, alpha=alpha, gain=gain, clamp=1.0, bias_gain=1.0)
    assert out3.shape == (N, C, H, W)
    assert jnp.allclose(out3.astype(jnp.float32), ref3.astype(jnp.float32),
                        atol=5e-2, rtol=5e-2), "mismatch vs reference (case 3)"

    print("KERNEL_OK")
</pallas_src>

<mosaic_0001>
module attributes {stable_mosaic.version = 11 : i64} {
  func.func @_biased_act_kernel(%arg0: i32, %arg1: i32, %arg2: memref<8x256xf32, #tpu.memory_space<vmem>>, %arg3: memref<8x1xf32, #tpu.memory_space<vmem>>, %arg4: memref<8x256xf32, #tpu.memory_space<vmem>>) attributes {dimension_semantics = [#tpu.dimension_semantics<parallel>, #tpu.dimension_semantics<parallel>], iteration_bounds = array<i64: 1, 1>, scalar_prefetch = 0 : i64, scratch_operands = 0 : i64, tpu.core_type = #tpu.core_type<tc>, window_params = [{transform_indices = @transform_0, window_bounds = array<i64: 8, 256>}, {transform_indices = @transform_1, window_bounds = array<i64: 8, 1>}, {transform_indices = @transform_2, window_bounds = array<i64: 8, 256>}]} {
    %c0 = arith.constant 0 : index
    %c0_0 = arith.constant 0 : index
    %0 = vector.load %arg2[%c0, %c0_0] : memref<8x256xf32, #tpu.memory_space<vmem>>, vector<8x256xf32>
    %c0_1 = arith.constant 0 : index
    %c0_2 = arith.constant 0 : index
    %1 = vector.load %arg3[%c0_1, %c0_2] : memref<8x1xf32, #tpu.memory_space<vmem>>, vector<8x1xf32>
    %2 = vector.broadcast %1 : vector<8x1xf32> to vector<8x256xf32>
    %3 = arith.addf %0, %2 : vector<8x256xf32>
    %cst = arith.constant 0.000000e+00 : f32
    %4 = vector.broadcast %cst : f32 to vector<8x256xf32>
    %5 = arith.cmpf oge, %3, %4 : vector<8x256xf32>
    %cst_3 = arith.constant 1.38675046 : f32
    %cst_4 = arith.constant 0.277350098 : f32
    %6 = vector.broadcast %cst_3 : f32 to vector<8x256xf32>
    %7 = vector.broadcast %cst_4 : f32 to vector<8x256xf32>
    %8 = arith.select %5, %6, %7 : vector<8x256xi1>, vector<8x256xf32>
    %9 = arith.mulf %3, %8 : vector<8x256xf32>
    %c0_5 = arith.constant 0 : index
    %c0_6 = arith.constant 0 : index
    %10 = vector.load %arg4[%c0_5, %c0_6] : memref<8x256xf32, #tpu.memory_space<vmem>>, vector<8x256xf32>
    tpu.vector_store %arg4[%c0_5, %c0_6], %9 {strides = array<i32>} : memref<8x256xf32, #tpu.memory_space<vmem>>, vector<8x256xf32>,
    return
  }
  func.func @transform_0(%arg0: i32, %arg1: i32) -> (i32, i32) {
    %c0_i32 = arith.constant 0 : i32
    return %arg0, %arg1 : i32, i32
  }
  func.func @transform_1(%arg0: i32, %arg1: i32) -> (i32, i32) {
    %c0_i32 = arith.constant 0 : i32
    %c0_i32_0 = arith.constant 0 : i32
    return %arg0, %c0_i32 : i32, i32
  }
  func.func @transform_2(%arg0: i32, %arg1: i32) -> (i32, i32) {
    %c0_i32 = arith.constant 0 : i32
    return %arg0, %arg1 : i32, i32
  }
}

</mosaic_0001>

<bundles_post_ra>
// kernel: tpu_custom_call.1
= control target key start
LH: loop header
LB: loop body
LE: loop exit
PB: predicated region body
PF: predicated region fallthrough
CT: control target
= control target key end

     0   :  { %7 = vsyncpa [#allocation3], 0  ;;  %s156_s0 = inlined_call_operand.hbm [shape: f32[8,256], index: 0, kind: input, shape index: {}]   ;;  %s157_s1 = inlined_call_operand.vmem [shape: f32[8,1], index: 1, kind: input, shape index: {}]   ;;  %s158_s2 = inlined_call_operand.hbm [shape: f32[8,256], index: 2, kind: output, shape index: {}]  }
   0x1   :  { %8 = vsyncpa [#allocation4], 0  ;;  %s110_s9 = smov [#allocation2]   ;;  %s62_s13 = scalar_lea.hbm %s156_s0, 256 }
   0x2   :  { %s15_s10 = sshll.u32 %s110_s9, 4  ;;  %p63_p0 = scmp.ne.s32.totalorder %s156_s0, %s62_s13  ;;  %s16_s10 = int_to_ptr.vmem [resolvable:$true] %s15_s10 }
   0x3   :  { %p66_p1 = scmp.lt.u32.totalorder %s62_s13, %s156_s0 }
   0x5   :  { %p68_p2 = pnand %p66_p1, %p63_p0 }
   0x7   :  { %71 = shalt.err (!%p68_p2)
}
   0x8   :  { %s72_s18 = scalar_lea.vmem %s16_s10, 256  ;;  %p77_p4 = scmp.lt.s32.totalorder %s16_s10, %s16_s10 }
   0x9   :  { %p73_p3 = scmp.ne.s32.totalorder %s16_s10, %s72_s18  ;;  %p78_p5 = scmp.lt.s32.totalorder %s72_s18, %s72_s18 }
   0xb   :  { %p79_p6 = por %p78_p5, %p77_p4 }
   0xd   :  { %p80_p7 = pnand %p79_p6, %p73_p3 }
   0xf   :  { %83 = shalt.err (!%p80_p7)
}
  0x10   :  { %18 = dma.hbm_to_vmem [thread:$0]  %s156_s0, 256, %s16_s10, [#allocation3]  }
  0x11   :  { %106 = dma.done.wait [#allocation3], 256  }
  0x12   :  { %107 = vsyncadd [#allocation3], 4294967040  ;;  %v111_v0 = vmov 0   ;;  %v26_v1 = vld [vmem:[%s157_s1] sm:$0xff]  ;;  %v25_v3 = vld [vmem:[#allocation2 + $0x8] sm:$0xff]  ;;  %s112_s23 = smov [#allocation5]  }
  0x13   :  { %61 = vset.pattern.permute.xlu0 %v111_v0  ;;  %v24_v2 = vld [vmem:[#allocation2] sm:$0xff]  ;;  %s48_s24 = sshll.u32 %s112_s23, 4  ;;  %v113_v7 = vmov 0.2773501   ;;  %s49_s24 = int_to_ptr.vmem [resolvable:$true] %s48_s24 }
  0x14   :  { %29 = vperm.xlu0 %61, %v26_v1   ;;  %s84_s0 = scalar_lea.vmem %s49_s24, 256  ;;  %p89_p9 = scmp.lt.s32.totalorder %s49_s24, %s49_s24 }
  0x15   :  { %p85_p8 = scmp.ne.s32.totalorder %s49_s24, %s84_s0  ;;  %p90_p10 = scmp.lt.s32.totalorder %s84_s0, %s84_s0 }
  0x17   :  { %p91_p11 = por %p90_p10, %p89_p9 }
  0x19   :  { %p92_p12 = pnand %p91_p11, %p85_p8 }
  0x93   :  { %v30_v4 = vpop.permute.xlu0 %29 }
  0x94   :  { %v32_v5 = vadd.f32 %v30_v4, %v24_v2  ;;  %v33_v6 = vadd.f32 %v30_v4, %v25_v3 }
  0x96   :  { %vm34_vm0 = vcmp.ge.f32.partialorder %v32_v5, 0.0  ;;  %vm35_vm1 = vcmp.ge.f32.partialorder %v33_v6, 0.0 }
  0x97   :  { %v36_v8 = vsel %vm34_vm0, 1.3867505, %v113_v7  ;;  %v37_v9 = vsel %vm35_vm1, 1.3867505, %v113_v7 }
  0x98   :  { %v38_v10 = vmul.f32 %v36_v8, %v32_v5  ;;  %v39_v11 = vmul.f32 %v37_v9, %v33_v6 }
  0x9a   :  { %40 = vst [vmem:[#allocation5] sm:$0xff] %v38_v10  ;;  %41 = vst [vmem:[#allocation5 + $0x8] sm:$0xff] %v39_v11 }
  0x9b   :  { %95 = shalt.err (!%p92_p12)
}
  0x9c   :  { %s96_s26 = scalar_lea.hbm %s158_s2, 256 }
  0x9d   :  { %p97_p13 = scmp.ne.s32.totalorder %s158_s2, %s96_s26  ;;  %p100_p0 = scmp.lt.u32.totalorder %s96_s26, %s158_s2 }
  0x9f   :  { %p102_p1 = pnand %p100_p0, %p97_p13 }
  0xa1   :  { %105 = shalt.err (!%p102_p1)
}
  0xa2   :  { %51 = dma.vmem_to_hbm [thread:$0]  %s49_s24, 256, %s158_s2, [#allocation4]  }
  0xa3   :  { %108 = dma.done.wait [#allocation4], 256  }
  0xa4   :  { %109 = vsyncadd [#allocation4], 4294967040 }
  0xa5   :  { %55 = vsyncpa [#allocation3], 1 }
  0xa6   :  { %56 = vsyncpa [#allocation4], 1 }

</bundles_post_ra>
